<compile_context>
chip_gen: v5e
topology: v5e:2x2
jax: 0.10.0
libtpu: 0.0.40
codegen_flags: <defaults>
</compile_context>

<pallas_src>
import jax
import jax.numpy as jnp
from jax.experimental import pallas as pl
from jax.experimental.pallas import tpu as pltpu

P_LAYER1_NUM = 64
P_LAYER2_NUM = 128
P_LAYER3_NUM = 256
P_LAYER4_NUM = 128
P_LAYER5_NUM = 64

_LANE = 128          # lane width: pad all feature dims to a multiple of this
_MAX_BATCH_TILE = 512


def _round_up(n, m):
    return (n + m - 1) // m * m


def _mlp_kernel(x_ref,
                w1_ref, b1_ref, w2_ref, b2_ref, w3_ref, b3_ref,
                w4_ref, b4_ref, w5_ref, b5_ref, w6_ref, b6_ref,
                out_ref):
    # x tile arrives in f32; cast to bf16 only for the MXU.  Bias add + ReLU
    # are done in f32 (VPU-native on all chips), accumulate in f32.
    h = x_ref[...].astype(jnp.bfloat16)
    for w_ref, b_ref in ((w1_ref, b1_ref), (w2_ref, b2_ref), (w3_ref, b3_ref),
                         (w4_ref, b4_ref), (w5_ref, b5_ref)):
        y = jnp.dot(h, w_ref[...], preferred_element_type=jnp.float32) + b_ref[...]
        h = jnp.maximum(y, 0.0).astype(jnp.bfloat16)
    out = jnp.dot(h, w6_ref[...], preferred_element_type=jnp.float32) + b6_ref[...]
    out_ref[...] = out.astype(out_ref.dtype)


def init_partition_net_params(key, n_states_p, n_actions_p):
    """Mirror the PyTorch init: W ~ Normal(0, 0.1), b ~ U(-1/sqrt(fan_in), ...).
    Returned weights are pre-transposed to [in, out], zero-padded to multiples
    of 128 on both dims, and stored in bf16; biases are f32 [1, out_pad]."""
    dims = [n_states_p, P_LAYER1_NUM, P_LAYER2_NUM, P_LAYER3_NUM,
            P_LAYER4_NUM, P_LAYER5_NUM, n_actions_p]
    params = []
    for i in range(len(dims) - 1):
        fan_in, fan_out = dims[i], dims[i + 1]
        in_pad, out_pad = _round_up(fan_in, _LANE), _round_up(fan_out, _LANE)
        key, kw, kb = jax.random.split(key, 3)
        w = 0.1 * jax.random.normal(kw, (fan_in, fan_out), dtype=jnp.float32)
        bound = 1.0 / (float(fan_in) ** 0.5)
        b = jax.random.uniform(kb, (fan_out,), dtype=jnp.float32,
                               minval=-bound, maxval=bound)
        w_pad = jnp.zeros((in_pad, out_pad), jnp.float32).at[:fan_in, :fan_out].set(w)
        b_pad = jnp.zeros((1, out_pad), jnp.float32).at[0, :fan_out].set(b)
        params.append((w_pad.astype(jnp.bfloat16), b_pad))
    return params


def partition_net_forward(x, params, n_actions_p):
    """Fused PartitionNet forward.

    x:      [B, n_states_p] float32
    params: list of (W_bf16 [in_pad, out_pad], b_f32 [1, out_pad]) from
            init_partition_net_params.
    Returns [B, n_actions_p] float32.
    """
    B, F = x.shape
    f_pad = params[0][0].shape[0]
    out_pad = params[-1][0].shape[1]

    # Batch tile: at least 8 sublanes, at most _MAX_BATCH_TILE rows.
    tb = min(_MAX_BATCH_TILE, _round_up(max(B, 1), 8))
    b_pad = _round_up(B, tb)
    num_tiles = b_pad // tb

    # Zero-pad batch rows and feature lanes (padded W rows/bias lanes are zero,
    # so padding contributes nothing to the real outputs).
    x_p = jnp.zeros((b_pad, f_pad), jnp.float32).at[:B, :F].set(
        x.astype(jnp.float32))

    flat_inputs = [x_p]
    in_specs = [pl.BlockSpec((tb, f_pad), lambda i: (i, 0))]
    for w, b in params:
        flat_inputs.append(w)
        flat_inputs.append(b)
        # Constant index maps: weights/biases stay resident across the grid.
        in_specs.append(pl.BlockSpec(w.shape, lambda i: (0, 0)))
        in_specs.append(pl.BlockSpec(b.shape, lambda i: (0, 0)))

    out_spec = pl.BlockSpec((tb, out_pad), lambda i: (i, 0))

    out = pl.pallas_call(
        _mlp_kernel,
        out_shape=jax.ShapeDtypeStruct((b_pad, out_pad), jnp.float32),
        grid=(num_tiles,),
        in_specs=in_specs,
        out_specs=out_spec,
        compiler_params=pltpu.CompilerParams(
            dimension_semantics=("parallel",),
            vmem_limit_bytes=32 * 1024 * 1024),
    )(*flat_inputs)

    return out[:B, :n_actions_p]


def _reference_forward(x, params, n_actions_p):
    """Pure-JAX reference with the identical mixed-precision path."""
    B, F = x.shape
    f_pad = params[0][0].shape[0]
    x_p = jnp.zeros((B, f_pad), jnp.float32).at[:, :F].set(x.astype(jnp.float32))
    h = x_p.astype(jnp.bfloat16)
    out = None
    for i, (w, b) in enumerate(params):
        y = jnp.dot(h, w, preferred_element_type=jnp.float32) + b
        if i < len(params) - 1:
            h = jnp.maximum(y, 0.0).astype(jnp.bfloat16)
        else:
            out = y
    return out[:, :n_actions_p]


if __name__ == "__main__":
    key = jax.random.PRNGKey(0)
    n_states_p = 16
    n_actions_p = 8
    batch = 4

    key, kx = jax.random.split(key)
    x = jax.random.normal(kx, (batch, n_states_p), dtype=jnp.float32)

    params = init_partition_net_params(key, n_states_p, n_actions_p)

    out = partition_net_forward(x, params, n_actions_p)
    out = jax.block_until_ready(out)

    ref = _reference_forward(x, params, n_actions_p)
    assert out.shape == (batch, n_actions_p)
    assert jnp.allclose(out, ref, atol=2e-3, rtol=2e-3), (
        f"max abs err {jnp.max(jnp.abs(out - ref))}")

    print("KERNEL_OK")
</pallas_src>

<mosaic_0001>
module attributes {stable_mosaic.version = 11 : i64} {
  func.func @_mlp_kernel(%arg0: i32, %arg1: memref<8x128xf32, #tpu.memory_space<vmem>>, %arg2: memref<128x128xbf16, #tpu.memory_space<vmem>>, %arg3: memref<1x128xf32, #tpu.memory_space<vmem>>, %arg4: memref<128x128xbf16, #tpu.memory_space<vmem>>, %arg5: memref<1x128xf32, #tpu.memory_space<vmem>>, %arg6: memref<128x256xbf16, #tpu.memory_space<vmem>>, %arg7: memref<1x256xf32, #tpu.memory_space<vmem>>, %arg8: memref<256x128xbf16, #tpu.memory_space<vmem>>, %arg9: memref<1x128xf32, #tpu.memory_space<vmem>>, %arg10: memref<128x128xbf16, #tpu.memory_space<vmem>>, %arg11: memref<1x128xf32, #tpu.memory_space<vmem>>, %arg12: memref<128x128xbf16, #tpu.memory_space<vmem>>, %arg13: memref<1x128xf32, #tpu.memory_space<vmem>>, %arg14: memref<8x128xf32, #tpu.memory_space<vmem>>) attributes {dimension_semantics = [#tpu.dimension_semantics<parallel>], iteration_bounds = array<i64: 1>, scalar_prefetch = 0 : i64, scratch_operands = 0 : i64, tpu.core_type = #tpu.core_type<tc>, window_params = [{transform_indices = @transform_0, window_bounds = array<i64: 8, 128>}, {pipeline_mode = #tpu.pipeline_mode<synchronous>, transform_indices = @transform_1, window_bounds = array<i64: 128, 128>}, {pipeline_mode = #tpu.pipeline_mode<synchronous>, transform_indices = @transform_2, window_bounds = array<i64: 1, 128>}, {pipeline_mode = #tpu.pipeline_mode<synchronous>, transform_indices = @transform_3, window_bounds = array<i64: 128, 128>}, {pipeline_mode = #tpu.pipeline_mode<synchronous>, transform_indices = @transform_4, window_bounds = array<i64: 1, 128>}, {pipeline_mode = #tpu.pipeline_mode<synchronous>, transform_indices = @transform_5, window_bounds = array<i64: 128, 256>}, {pipeline_mode = #tpu.pipeline_mode<synchronous>, transform_indices = @transform_6, window_bounds = array<i64: 1, 256>}, {pipeline_mode = #tpu.pipeline_mode<synchronous>, transform_indices = @transform_7, window_bounds = array<i64: 256, 128>}, {pipeline_mode = #tpu.pipeline_mode<synchronous>, transform_indices = @transform_8, window_bounds = array<i64: 1, 128>}, {pipeline_mode = #tpu.pipeline_mode<synchronous>, transform_indices = @transform_9, window_bounds = array<i64: 128, 128>}, {pipeline_mode = #tpu.pipeline_mode<synchronous>, transform_indices = @transform_10, window_bounds = array<i64: 1, 128>}, {pipeline_mode = #tpu.pipeline_mode<synchronous>, transform_indices = @transform_11, window_bounds = array<i64: 128, 128>}, {pipeline_mode = #tpu.pipeline_mode<synchronous>, transform_indices = @transform_12, window_bounds = array<i64: 1, 128>}, {transform_indices = @transform_13, window_bounds = array<i64: 8, 128>}]} {
    %c0 = arith.constant 0 : index
    %c0_0 = arith.constant 0 : index
    %0 = vector.load %arg1[%c0, %c0_0] : memref<8x128xf32, #tpu.memory_space<vmem>>, vector<8x128xf32>
    %1 = arith.truncf %0 : vector<8x128xf32> to vector<8x128xbf16>
    %c0_1 = arith.constant 0 : index
    %c0_2 = arith.constant 0 : index
    %2 = vector.load %arg2[%c0_1, %c0_2] : memref<128x128xbf16, #tpu.memory_space<vmem>>, vector<128x128xbf16>
    %cst = arith.constant dense<0.000000e+00> : vector<8x128xf32>
    %3 = tpu.matmul %1, %2, %cst {dimension_numbers = #tpu.dot_dimension_numbers<[1], [0], [0], [1], [0, 0, 1, 1], [], []>} : vector<8x128xbf16>, vector<128x128xbf16>, vector<8x128xf32> -> vector<8x128xf32>
    %c0_3 = arith.constant 0 : index
    %c0_4 = arith.constant 0 : index
    %4 = vector.load %arg3[%c0_3, %c0_4] : memref<1x128xf32, #tpu.memory_space<vmem>>, vector<1x128xf32>
    %5 = vector.broadcast %4 : vector<1x128xf32> to vector<8x128xf32>
    %6 = arith.addf %3, %5 : vector<8x128xf32>
    %cst_5 = arith.constant 0.000000e+00 : f32
    %7 = vector.broadcast %cst_5 : f32 to vector<8x128xf32>
    %8 = arith.maximumf %6, %7 : vector<8x128xf32>
    %9 = arith.truncf %8 : vector<8x128xf32> to vector<8x128xbf16>
    %c0_6 = arith.constant 0 : index
    %c0_7 = arith.constant 0 : index
    %10 = vector.load %arg4[%c0_6, %c0_7] : memref<128x128xbf16, #tpu.memory_space<vmem>>, vector<128x128xbf16>
    %cst_8 = arith.constant dense<0.000000e+00> : vector<8x128xf32>
    %11 = tpu.matmul %9, %10, %cst_8 {dimension_numbers = #tpu.dot_dimension_numbers<[1], [0], [0], [1], [0, 0, 1, 1], [], []>} : vector<8x128xbf16>, vector<128x128xbf16>, vector<8x128xf32> -> vector<8x128xf32>
    %c0_9 = arith.constant 0 : index
    %c0_10 = arith.constant 0 : index
    %12 = vector.load %arg5[%c0_9, %c0_10] : memref<1x128xf32, #tpu.memory_space<vmem>>, vector<1x128xf32>
    %13 = vector.broadcast %12 : vector<1x128xf32> to vector<8x128xf32>
    %14 = arith.addf %11, %13 : vector<8x128xf32>
    %cst_11 = arith.constant 0.000000e+00 : f32
    %15 = vector.broadcast %cst_11 : f32 to vector<8x128xf32>
    %16 = arith.maximumf %14, %15 : vector<8x128xf32>
    %17 = arith.truncf %16 : vector<8x128xf32> to vector<8x128xbf16>
    %c0_12 = arith.constant 0 : index
    %c0_13 = arith.constant 0 : index
    %18 = vector.load %arg6[%c0_12, %c0_13] : memref<128x256xbf16, #tpu.memory_space<vmem>>, vector<128x256xbf16>
    %cst_14 = arith.constant dense<0.000000e+00> : vector<8x256xf32>
    %19 = tpu.matmul %17, %18, %cst_14 {dimension_numbers = #tpu.dot_dimension_numbers<[1], [0], [0], [1], [0, 0, 1, 1], [], []>} : vector<8x128xbf16>, vector<128x256xbf16>, vector<8x256xf32> -> vector<8x256xf32>
    %c0_15 = arith.constant 0 : index
    %c0_16 = arith.constant 0 : index
    %20 = vector.load %arg7[%c0_15, %c0_16] : memref<1x256xf32, #tpu.memory_space<vmem>>, vector<1x256xf32>
    %21 = vector.broadcast %20 : vector<1x256xf32> to vector<8x256xf32>
    %22 = arith.addf %19, %21 : vector<8x256xf32>
    %cst_17 = arith.constant 0.000000e+00 : f32
    %23 = vector.broadcast %cst_17 : f32 to vector<8x256xf32>
    %24 = arith.maximumf %22, %23 : vector<8x256xf32>
    %25 = arith.truncf %24 : vector<8x256xf32> to vector<8x256xbf16>
    %c0_18 = arith.constant 0 : index
    %c0_19 = arith.constant 0 : index
    %26 = vector.load %arg8[%c0_18, %c0_19] : memref<256x128xbf16, #tpu.memory_space<vmem>>, vector<256x128xbf16>
    %cst_20 = arith.constant dense<0.000000e+00> : vector<8x128xf32>
    %27 = tpu.matmul %25, %26, %cst_20 {dimension_numbers = #tpu.dot_dimension_numbers<[1], [0], [0], [1], [0, 0, 1, 1], [], []>} : vector<8x256xbf16>, vector<256x128xbf16>, vector<8x128xf32> -> vector<8x128xf32>
    %c0_21 = arith.constant 0 : index
    %c0_22 = arith.constant 0 : index
    %28 = vector.load %arg9[%c0_21, %c0_22] : memref<1x128xf32, #tpu.memory_space<vmem>>, vector<1x128xf32>
    %29 = vector.broadcast %28 : vector<1x128xf32> to vector<8x128xf32>
    %30 = arith.addf %27, %29 : vector<8x128xf32>
    %cst_23 = arith.constant 0.000000e+00 : f32
    %31 = vector.broadcast %cst_23 : f32 to vector<8x128xf32>
    %32 = arith.maximumf %30, %31 : vector<8x128xf32>
    %33 = arith.truncf %32 : vector<8x128xf32> to vector<8x128xbf16>
    %c0_24 = arith.constant 0 : index
    %c0_25 = arith.constant 0 : index
    %34 = vector.load %arg10[%c0_24, %c0_25] : memref<128x128xbf16, #tpu.memory_space<vmem>>, vector<128x128xbf16>
    %cst_26 = arith.constant dense<0.000000e+00> : vector<8x128xf32>
    %35 = tpu.matmul %33, %34, %cst_26 {dimension_numbers = #tpu.dot_dimension_numbers<[1], [0], [0], [1], [0, 0, 1, 1], [], []>} : vector<8x128xbf16>, vector<128x128xbf16>, vector<8x128xf32> -> vector<8x128xf32>
    %c0_27 = arith.constant 0 : index
    %c0_28 = arith.constant 0 : index
    %36 = vector.load %arg11[%c0_27, %c0_28] : memref<1x128xf32, #tpu.memory_space<vmem>>, vector<1x128xf32>
    %37 = vector.broadcast %36 : vector<1x128xf32> to vector<8x128xf32>
    %38 = arith.addf %35, %37 : vector<8x128xf32>
    %cst_29 = arith.constant 0.000000e+00 : f32
    %39 = vector.broadcast %cst_29 : f32 to vector<8x128xf32>
    %40 = arith.maximumf %38, %39 : vector<8x128xf32>
    %41 = arith.truncf %40 : vector<8x128xf32> to vector<8x128xbf16>
    %c0_30 = arith.constant 0 : index
    %c0_31 = arith.constant 0 : index
    %42 = vector.load %arg12[%c0_30, %c0_31] : memref<128x128xbf16, #tpu.memory_space<vmem>>, vector<128x128xbf16>
    %cst_32 = arith.constant dense<0.000000e+00> : vector<8x128xf32>
    %43 = tpu.matmul %41, %42, %cst_32 {dimension_numbers = #tpu.dot_dimension_numbers<[1], [0], [0], [1], [0, 0, 1, 1], [], []>} : vector<8x128xbf16>, vector<128x128xbf16>, vector<8x128xf32> -> vector<8x128xf32>
    %c0_33 = arith.constant 0 : index
    %c0_34 = arith.constant 0 : index
    %44 = vector.load %arg13[%c0_33, %c0_34] : memref<1x128xf32, #tpu.memory_space<vmem>>, vector<1x128xf32>
    %45 = vector.broadcast %44 : vector<1x128xf32> to vector<8x128xf32>
    %46 = arith.addf %43, %45 : vector<8x128xf32>
    %c0_35 = arith.constant 0 : index
    %c0_36 = arith.constant 0 : index
    %47 = vector.load %arg14[%c0_35, %c0_36] : memref<8x128xf32, #tpu.memory_space<vmem>>, vector<8x128xf32>
    tpu.vector_store %arg14[%c0_35, %c0_36], %46 {strides = array<i32>} : memref<8x128xf32, #tpu.memory_space<vmem>>, vector<8x128xf32>,
    return
  }
  func.func @transform_0(%arg0: i32) -> (i32, i32) {
    %c0_i32 = arith.constant 0 : i32
    %c0_i32_0 = arith.constant 0 : i32
    return %arg0, %c0_i32 : i32, i32
  }
  func.func @transform_1(%arg0: i32) -> (i32, i32) {
    %c0_i32 = arith.constant 0 : i32
    %c0_i32_0 = arith.constant 0 : i32
    %c0_i32_1 = arith.constant 0 : i32
    return %c0_i32, %c0_i32_0 : i32, i32
  }
  func.func @transform_2(%arg0: i32) -> (i32, i32) {
    %c0_i32 = arith.constant 0 : i32
    %c0_i32_0 = arith.constant 0 : i32
    %c0_i32_1 = arith.constant 0 : i32
    return %c0_i32, %c0_i32_0 : i32, i32
  }
  func.func @transform_3(%arg0: i32) -> (i32, i32) {
    %c0_i32 = arith.constant 0 : i32
    %c0_i32_0 = arith.constant 0 : i32
    %c0_i32_1 = arith.constant 0 : i32
    return %c0_i32, %c0_i32_0 : i32, i32
  }
  func.func @transform_4(%arg0: i32) -> (i32, i32) {
    %c0_i32 = arith.constant 0 : i32
    %c0_i32_0 = arith.constant 0 : i32
    %c0_i32_1 = arith.constant 0 : i32
    return %c0_i32, %c0_i32_0 : i32, i32
  }
  func.func @transform_5(%arg0: i32) -> (i32, i32) {
    %c0_i32 = arith.constant 0 : i32
    %c0_i32_0 = arith.constant 0 : i32
    %c0_i32_1 = arith.constant 0 : i32
    return %c0_i32, %c0_i32_0 : i32, i32
  }
  func.func @transform_6(%arg0: i32) -> (i32, i32) {
    %c0_i32 = arith.constant 0 : i32
    %c0_i32_0 = arith.constant 0 : i32
    %c0_i32_1 = arith.constant 0 : i32
    return %c0_i32, %c0_i32_0 : i32, i32
  }
  func.func @transform_7(%arg0: i32) -> (i32, i32) {
    %c0_i32 = arith.constant 0 : i32
    %c0_i32_0 = arith.constant 0 : i32
    %c0_i32_1 = arith.constant 0 : i32
    return %c0_i32, %c0_i32_0 : i32, i32
  }
  func.func @transform_8(%arg0: i32) -> (i32, i32) {
    %c0_i32 = arith.constant 0 : i32
    %c0_i32_0 = arith.constant 0 : i32
    %c0_i32_1 = arith.constant 0 : i32
    return %c0_i32, %c0_i32_0 : i32, i32
  }
  func.func @transform_9(%arg0: i32) -> (i32, i32) {
    %c0_i32 = arith.constant 0 : i32
    %c0_i32_0 = arith.constant 0 : i32
    %c0_i32_1 = arith.constant 0 : i32
    return %c0_i32, %c0_i32_0 : i32, i32
  }
  func.func @transform_10(%arg0: i32) -> (i32, i32) {
    %c0_i32 = arith.constant 0 : i32
    %c0_i32_0 = arith.constant 0 : i32
    %c0_i32_1 = arith.constant 0 : i32
    return %c0_i32, %c0_i32_0 : i32, i32
  }
  func.func @transform_11(%arg0: i32) -> (i32, i32) {
    %c0_i32 = arith.constant 0 : i32
    %c0_i32_0 = arith.constant 0 : i32
    %c0_i32_1 = arith.constant 0 : i32
    return %c0_i32, %c0_i32_0 : i32, i32
  }
  func.func @transform_12(%arg0: i32) -> (i32, i32) {
    %c0_i32 = arith.constant 0 : i32
    %c0_i32_0 = arith.constant 0 : i32
    %c0_i32_1 = arith.constant 0 : i32
    return %c0_i32, %c0_i32_0 : i32, i32
  }
  func.func @transform_13(%arg0: i32) -> (i32, i32) {
    %c0_i32 = arith.constant 0 : i32
    %c0_i32_0 = arith.constant 0 : i32
    return %arg0, %c0_i32 : i32, i32
  }
}

</mosaic_0001>

<bundles_post_ra>
// kernel: tpu_custom_call.1
= control target key start
LH: loop header
LB: loop body
LE: loop exit
PB: predicated region body
PF: predicated region fallthrough
CT: control target
= control target key end

     0   :  { %18 = vsyncpa [#allocation3], 0  ;;  %s1518_s0 = inlined_call_operand.hbm [shape: f32[8,128], index: 0, kind: input, shape index: {}]   ;;  %s1519_s1 = inlined_call_operand.hbm [shape: bf16[128,128], index: 1, kind: input, shape index: {}]   ;;  %s1520_s2 = inlined_call_operand.vmem [shape: f32[1,128], index: 2, kind: input, shape index: {}]   ;;  %s1521_s3 = inlined_call_operand.hbm [shape: bf16[128,128], index: 3, kind: input, shape index: {}]   ;;  %s1522_s4 = inlined_call_operand.hbm [shape: f32[1,128], index: 4, kind: input, shape index: {}]   ;;  %s1523_s5 = inlined_call_operand.hbm [shape: bf16[128,256], index: 5, kind: input, shape index: {}]   ;;  %s1524_s6 = inlined_call_operand.vmem [shape: f32[1,256], index: 6, kind: input, shape index: {}]   ;;  %s1525_s7 = inlined_call_operand.hbm [shape: bf16[256,128], index: 7, kind: input, shape index: {}]   ;;  %s1526_s8 = inlined_call_operand.vmem [shape: f32[1,128], index: 8, kind: input, shape index: {}]   ;;  %s1527_s9 = inlined_call_operand.hbm [shape: bf16[128,128], index: 9, kind: input, shape index: {}]   ;;  %s1528_s10 = inlined_call_operand.vmem [shape: f32[1,128], index: 10, kind: input, shape index: {}]   ;;  %s1529_s11 = inlined_call_operand.hbm [shape: bf16[128,128], index: 11, kind: input, shape index: {}]   ;;  %s1530_s12 = inlined_call_operand.vmem [shape: f32[1,128], index: 12, kind: input, shape index: {}]   ;;  %s1531_s13 = inlined_call_operand.hbm [shape: f32[8,128], index: 13, kind: output, shape index: {}]  }
   0x1   :  { %19 = vsyncpa [#allocation6], 0 }
   0x2   :  { %20 = vsyncpa [#allocation9], 0 }
   0x3   :  { %21 = vsyncpa [#allocation12], 0 }
   0x4   :  { %22 = vsyncpa [#allocation15], 0  ;;  %s39_s27 = sshll.u32 %s1519_s1, 4  ;;  %s40_s27 = int_to_ptr.hbm [resolvable:$true] %s39_s27 }
   0x5   :  { %23 = vsyncpa [#allocation4], 0  ;;  %s1378_s28 = smov [#allocation5]   ;;  %s68_s15 = sshll.u32 %s1522_s4, 4  ;;  %s69_s15 = int_to_ptr.hbm [resolvable:$true] %s68_s15 }
   0x6   :  { %s41_s29 = sshll.u32 %s1378_s28, 4  ;;  %s1379_s16 = smov 64   ;;  %s42_s29 = int_to_ptr.vmem [resolvable:$true] %s41_s29 }
   0x7   :  { %s1380_s17 = smov 4   ;;  %s1381_s18 = smov [#allocation8]  }
   0x8   :  { %47 = dma.hbm_to_vmem [thread:$0]  %s40_s27, 1024, %s42_s29, [#allocation6], %s1379_s16, %s1379_s16, %s1380_s17  }
   0x9   :  { %s70_s19 = sshll.u32 %s1381_s18, 4  ;;  %s93_s21 = sshll.u32 %s1525_s7, 4  ;;  %s71_s19 = int_to_ptr.vmem [resolvable:$true] %s70_s19  ;;  %s94_s21 = int_to_ptr.hbm [resolvable:$true] %s93_s21 }
   0xa   :  { %73 = dma.hbm_to_vmem [thread:$0]  %s69_s15, 16, %s71_s19, [#allocation9]  }
   0xb   :  { %s29_s4 = sshll.u32 %s1518_s0, 4  ;;  %s1382_s24 = smov [#allocation11]   ;;  %s30_s4 = int_to_ptr.hbm [resolvable:$true] %s29_s4 }
   0xc   :  { %s95_s25 = sshll.u32 %s1382_s24, 4  ;;  %s1383_s26 = smov [#allocation2]   ;;  %s96_s25 = int_to_ptr.vmem [resolvable:$true] %s95_s25 }
   0xd   :  { %101 = dma.hbm_to_vmem [thread:$0]  %s94_s21, 2048, %s96_s25, [#allocation12], %s1379_s16, %s1379_s16, %s1380_s17  }
   0xe   :  { %s31_s27 = sshll.u32 %s1383_s26, 4  ;;  %s54_s7 = sshll.u32 %s1521_s3, 4  ;;  %s32_s27 = int_to_ptr.vmem [resolvable:$true] %s31_s27  ;;  %s55_s7 = int_to_ptr.hbm [resolvable:$true] %s54_s7 }
   0xf   :  { %34 = dma.hbm_to_vmem [thread:$0]  %s30_s4, 128, %s32_s27, [#allocation3]  }
  0x10   :  { %s78_s0 = sshll.u32 %s1523_s5, 4  ;;  %s1384_s15 = smov [#allocation7]   ;;  %s79_s0 = int_to_ptr.hbm [resolvable:$true] %s78_s0 }
  0x11   :  { %s56_s18 = sshll.u32 %s1384_s15, 4  ;;  %s1385_s19 = smov [#allocation10]   ;;  %s57_s18 = int_to_ptr.vmem [resolvable:$true] %s56_s18 }
  0x12   :  { %62 = dma.hbm_to_vmem [thread:$0]  %s55_s7, 1024, %s57_s18, [#allocation6], %s1379_s16, %s1379_s16, %s1380_s17  }
  0x13   :  { %s80_s20 = sshll.u32 %s1385_s19, 4  ;;  %s1386_s1 = smov 128   ;;  %s81_s20 = int_to_ptr.vmem [resolvable:$true] %s80_s20 }
  0x14   :  { %s1387_s3 = smov 8   ;;  %s108_s23 = sshll.u32 %s1527_s9, 4  ;;  %s109_s23 = int_to_ptr.hbm [resolvable:$true] %s108_s23 }
  0x15   :  { %86 = dma.hbm_to_vmem [thread:$0]  %s79_s0, 2048, %s81_s20, [#allocation9], %s1386_s1, %s1386_s1, %s1387_s3  }
  0x16   :  { %s1388_s5 = smov [#allocation13]   ;;  %s123_s26 = sshll.u32 %s1529_s11, 4  ;;  %s124_s26 = int_to_ptr.hbm [resolvable:$true] %s123_s26 }
  0x17   :  { %s110_s4 = sshll.u32 %s1388_s5, 4  ;;  %s1389_s27 = smov [#allocation14]   ;;  %s111_s4 = int_to_ptr.vmem [resolvable:$true] %s110_s4 }
  0x18   :  { %116 = dma.hbm_to_vmem [thread:$0]  %s109_s23, 1024, %s111_s4, [#allocation12], %s1379_s16, %s1379_s16, %s1380_s17  }
  0x19   :  { %s125_s28 = sshll.u32 %s1389_s27, 4  ;;  %s126_s28 = int_to_ptr.vmem [resolvable:$true] %s125_s28 }
  0x1a   :  { %131 = dma.hbm_to_vmem [thread:$0]  %s124_s26, 1024, %s126_s28, [#allocation15], %s1379_s16, %s1379_s16, %s1380_s17  }
  0x1b   :  { %1366 = dma.done.wait [#allocation3], 128  }
  0x1c   :  { %1367 = vsyncadd [#allocation3], 4294967168 }
  0x1d   :  { %1368 = dma.done.wait [#allocation6], 2048  }
  0x1e   :  { %1369 = vsyncadd [#allocation6], 4294965248 }
  0x1f   :  { %1370 = dma.done.wait [#allocation9], 2064  }
  0x20   :  { %1371 = vsyncadd [#allocation9], 4294965232 }
  0x21   :  { %1372 = dma.done.wait [#allocation12], 3072  }
  0x22   :  { %1373 = vsyncadd [#allocation12], 4294964224 }
  0x23   :  { %1374 = dma.done.wait [#allocation15], 1024  }
  0x24   :  { %1375 = vsyncadd [#allocation15], 4294966272  ;;  %v1075_v0 = vld [vmem:[#allocation5 + $0x38] sm:$0xff]  ;;  %v1074_v1 = vld [vmem:[#allocation5 + $0x30] sm:$0xff]  ;;  %s1390_s14 = smov [#allocation16]   ;;  %s798_s19 = sshll.u32 %s1531_s13, 4  ;;  %s799_s19 = int_to_ptr.hbm [resolvable:$true] %s798_s19 }
  0x25   :  { %236 = vmatpush.bf16.msra.mxu0 %v1075_v0  ;;  %v1083_v2 = vld [vmem:[#allocation7 + $0x38] sm:$0xff]  ;;  %v1073_v3 = vld [vmem:[#allocation5 + $0x28] sm:$0xff]  ;;  %v1082_v4 = vld [vmem:[#allocation7 + $0x30] sm:$0xff]  ;;  %s796_s0 = sshll.u32 %s1390_s14, 4  ;;  %s797_s0 = int_to_ptr.vmem [resolvable:$true] %s796_s0 }
  0x26   :  { %319 = vmatpush.bf16.msra.mxu1 %v1083_v2  ;;  %v1081_v5 = vld [vmem:[#allocation7 + $0x28] sm:$0xff]  ;;  %v1072_v6 = vld [vmem:[#allocation5 + $0x20] sm:$0xff]  ;;  %v1071_v8 = vld [vmem:[#allocation5 + $0x18] sm:$0xff] }
  0x27   :  { %v1080_v7 = vld [vmem:[#allocation7 + $0x20] sm:$0xff]  ;;  %v1079_v9 = vld [vmem:[#allocation7 + $0x18] sm:$0xff]  ;;  %v1070_v10 = vld [vmem:[#allocation5 + $0x10] sm:$0xff] }
  0x28   :  { %v1078_v11 = vld [vmem:[#allocation7 + $0x10] sm:$0xff]  ;;  %v1069_v12 = vld [vmem:[#allocation5 + $0x8] sm:$0xff]  ;;  %v1068_v13 = vld [vmem:[#allocation5] sm:$0xff] }
  0x29   :  { %237 = vmatpush.bf16.msra.mxu0 %v1074_v1  ;;  %v166_v14 = vld [vmem:[#allocation2] sm:$0xff]  ;;  %v1077_v16 = vld [vmem:[#allocation7 + $0x8] sm:$0xff]  ;;  %v1076_v17 = vld [vmem:[#allocation7] sm:$0xff] }
  0x2a   :  { %320 = vmatpush.bf16.msra.mxu1 %v1082_v4  ;;  %v167_v15 = vpack.c.bf16 %v166_v14, %v166_v14  ;;  %v934_v18 = vld [vmem:[#allocation10 + $0x70] sm:$0xf]  ;;  %v1099_v19 = vld [vmem:[#allocation10 + $0x74] sm:$0xf0]  ;;  %v1098_v20 = vld [vmem:[#allocation10 + $0x74] sm:$0xf] }
  0x2b   :  { %v935_v21 = vor.u32 %v1099_v19, %v934_v18  ;;  %v936_v22 = vld [vmem:[#allocation10 + $0x78] sm:$0xf0]  ;;  %v926_v23 = vld [vmem:[#allocation10 + $0x60] sm:$0xf]  ;;  %v1097_v24 = vld [vmem:[#allocation10 + $0x64] sm:$0xf0] }
  0x2c   :  { %v939_v25 = vor.u32 %v1098_v20, %v936_v22  ;;  %v1096_v26 = vld [vmem:[#allocation10 + $0x64] sm:$0xf]  ;;  %v928_v27 = vld [vmem:[#allocation10 + $0x68] sm:$0xf0]  ;;  %v927_v28 = vor.u32 %v1097_v24, %v926_v23  ;;  %v918_v30 = vld [vmem:[#allocation10 + $0x50] sm:$0xf] }
  0x2d   :  { %238 = vmatpush.bf16.msra.mxu0 %v1073_v3  ;;  %436 = vmatpush.bf16.msra.mxu2 %v935_v21  ;;  %v931_v29 = vor.u32 %v1096_v26, %v928_v27  ;;  %v1095_v31 = vld [vmem:[#allocation10 + $0x54] sm:$0xf0]  ;;  %v1094_v32 = vld [vmem:[#allocation10 + $0x54] sm:$0xf]  ;;  %v920_v33 = vld [vmem:[#allocation10 + $0x58] sm:$0xf0] }
  0x2e   :  { %321 = vmatpush.bf16.msra.mxu1 %v1081_v5  ;;  %449 = vmatpush.bf16.msra.mxu3 %v939_v25  ;;  %v919_v34 = vor.u32 %v1095_v31, %v918_v30  ;;  %v923_v35 = vor.u32 %v1094_v32, %v920_v33  ;;  %v910_v36 = vld [vmem:[#allocation10 + $0x40] sm:$0xf]  ;;  %v1093_v37 = vld [vmem:[#allocation10 + $0x44] sm:$0xf0]  ;;  %v1092_v38 = vld [vmem:[#allocation10 + $0x44] sm:$0xf] }
  0x2f   :  { %v912_v39 = vld [vmem:[#allocation10 + $0x48] sm:$0xf0]  ;;  %v911_v40 = vor.u32 %v1093_v37, %v910_v36  ;;  %v902_v42 = vld [vmem:[#allocation10 + $0x30] sm:$0xf]  ;;  %v1091_v43 = vld [vmem:[#allocation10 + $0x34] sm:$0xf0] }
  0x30   :  { %v915_v41 = vor.u32 %v1092_v38, %v912_v39  ;;  %v1090_v44 = vld [vmem:[#allocation10 + $0x34] sm:$0xf]  ;;  %v904_v45 = vld [vmem:[#allocation10 + $0x38] sm:$0xf0]  ;;  %v903_v46 = vor.u32 %v1091_v43, %v902_v42  ;;  %v894_v48 = vld [vmem:[#allocation10 + $0x20] sm:$0xf] }
  0x31   :  { %239 = vmatpush.bf16.msra.mxu0 %v1072_v6  ;;  %437 = vmatpush.bf16.msra.mxu2 %v927_v28  ;;  %v907_v47 = vor.u32 %v1090_v44, %v904_v45  ;;  %v1089_v49 = vld [vmem:[#allocation10 + $0x24] sm:$0xf0]  ;;  %v1088_v50 = vld [vmem:[#allocation10 + $0x24] sm:$0xf]  ;;  %v896_v51 = vld [vmem:[#allocation10 + $0x28] sm:$0xf0] }
  0x32   :  { %322 = vmatpush.bf16.msra.mxu1 %v1080_v7  ;;  %450 = vmatpush.bf16.msra.mxu3 %v931_v29  ;;  %v895_v52 = vor.u32 %v1089_v49, %v894_v48  ;;  %v899_v53 = vor.u32 %v1088_v50, %v896_v51  ;;  %v1145_v54 = vld [vmem:[%s1520_s2] ss:$0 sm:$0xff]  ;;  %v886_v60 = vld [vmem:[#allocation10 + $0x10] sm:$0xf]  ;;  %v1087_v61 = vld [vmem:[#allocation10 + $0x14] sm:$0xf0] }
  0x33   :  { %v1086_v62 = vld [vmem:[#allocation10 + $0x14] sm:$0xf]  ;;  %v887_v63 = vor.u32 %v1087_v61, %v886_v60  ;;  %v888_v0 = vld [vmem:[#allocation10 + $0x18] sm:$0xf0]  ;;  %v878_v2 = vld [vmem:[#allocation10] sm:$0xf] }
  0x34   :  { %v891_v1 = vor.u32 %v1086_v62, %v888_v0  ;;  %v1085_v3 = vld [vmem:[#allocation10 + $0x4] sm:$0xf0]  ;;  %v1084_v4 = vld [vmem:[#allocation10 + $0x4] sm:$0xf]  ;;  %v880_v6 = vld [vmem:[#allocation10 + $0x8] sm:$0xf0] }
  0x35   :  { %240 = vmatpush.bf16.msra.mxu0 %v1071_v8  ;;  %438 = vmatpush.bf16.msra.mxu2 %v919_v34  ;;  %v879_v5 = vor.u32 %v1085_v3, %v878_v2  ;;  %v883_v7 = vor.u32 %v1084_v4, %v880_v6  ;;  %v1107_v8 = vld [vmem:[#allocation11 + $0x38] sm:$0xff]  ;;  %v1104_v14 = vld [vmem:[#allocation11 + $0x20] sm:$0xff]  ;;  %v1102_v18 = vld [vmem:[#allocation11 + $0x10] sm:$0xff] }
  0x36   :  { %323 = vmatpush.bf16.msra.mxu1 %v1079_v9  ;;  %451 = vmatpush.bf16.msra.mxu3 %v923_v35  ;;  %v1115_v9 = vld [vmem:[#allocation11 + $0x78] sm:$0xff]  ;;  %v1110_v19 = vld [vmem:[#allocation11 + $0x50] sm:$0xff]  ;;  %v1101_v26 = vld [vmem:[#allocation11 + $0x8] sm:$0xff] }
  0x37   :  { %v1146_v20 = vld [vmem:[#allocation8] ss:$0 sm:$0xff]  ;;  %v1109_v27 = vld [vmem:[#allocation11 + $0x48] sm:$0xff]  ;;  %v1100_v28 = vld [vmem:[#allocation11] sm:$0xff] }
  0x38   :  { %v1108_v29 = vld [vmem:[#allocation11 + $0x40] sm:$0xff]  ;;  %v1123_v30 = vld [vmem:[#allocation13 + $0x38] sm:$0xff]  ;;  %v1122_v31 = vld [vmem:[#allocation13 + $0x30] sm:$0xff] }
  0x39   :  { %241 = vmatpush.bf16.msra.mxu0 %v1070_v10  ;;  %439 = vmatpush.bf16.msra.mxu2 %v911_v40  ;;  %v1106_v10 = vld [vmem:[#allocation11 + $0x30] sm:$0xff]  ;;  %v1121_v32 = vld [vmem:[#allocation13 + $0x28] sm:$0xff]  ;;  %v1120_v33 = vld [vmem:[#allocation13 + $0x20] sm:$0xff] }
  0x3a   :  { %324 = vmatpush.bf16.msra.mxu1 %v1078_v11  ;;  %452 = vmatpush.bf16.msra.mxu3 %v915_v41  ;;  %v1114_v11 = vld [vmem:[#allocation11 + $0x70] sm:$0xff]  ;;  %v1119_v34 = vld [vmem:[#allocation13 + $0x18] sm:$0xff]  ;;  %v1117_v49 = vld [vmem:[#allocation13 + $0x8] sm:$0xff] }
  0x3b   :  { %v350_v35 = vld [vmem:[%s1524_s6] sm:$0x3]  ;;  %v1116_v50 = vld [vmem:[#allocation13] sm:$0xff]  ;;  %v1131_v51 = vld [vmem:[#allocation14 + $0x38] sm:$0xff] }
  0x3c   :  { %v1118_v36 = vld [vmem:[#allocation13 + $0x10] sm:$0xff]  ;;  %v352_v37 = vperm.slane %v350_v35, 0  ;;  %v353_v38 = vperm.slane %v350_v35, 1  ;;  %v1125_v2 = vld [vmem:[#allocation14 + $0x8] sm:$0xff]  ;;  %v1124_v3 = vld [vmem:[#allocation14] sm:$0xff] }
  0x3d   :  { %242 = vmatpush.bf16.msra.mxu0 %v1069_v12  ;;  %440 = vmatpush.bf16.msra.mxu2 %v903_v46  ;;  %v1105_v12 = vld [vmem:[#allocation11 + $0x28] sm:$0xff]  ;;  %v1148_v4 = vld [vmem:[%s1528_s10] ss:$0 sm:$0xff] }
  0x3e   :  { %325 = vmatpush.bf16.msra.mxu1 %v1077_v16  ;;  %453 = vmatpush.bf16.msra.mxu3 %v907_v47  ;;  %v1103_v16 = vld [vmem:[#allocation11 + $0x18] sm:$0xff] }
  0x41   :  { %243 = vmatpush.bf16.msra.mxu0 %v1068_v13  ;;  %441 = vmatpush.bf16.msra.mxu2 %v895_v52  ;;  %v1113_v13 = vld [vmem:[#allocation11 + $0x68] sm:$0xff]  ;;  %v1130_v52 = vld [vmem:[#allocation14 + $0x30] sm:$0xff] }
  0x42   :  { %326 = vmatpush.bf16.msra.mxu1 %v1076_v17  ;;  %454 = vmatpush.bf16.msra.mxu3 %v899_v53  ;;  %v1111_v17 = vld [vmem:[#allocation11 + $0x58] sm:$0xff]  ;;  %v1129_v53 = vld [vmem:[#allocation14 + $0x28] sm:$0xff] }
  0x44   :  { %244 = vmatmul.bf16.vlgmr.msra.gmra.mxu0 %v167_v15  ;;  %v1112_v15 = vld [vmem:[#allocation11 + $0x60] sm:$0xff] }
  0x45   :  { %442 = vmatpush.bf16.msra.mxu2 %v887_v63  ;;  %598 = vmatpush.bf16.msrb.mxu0 %v1107_v8 }
  0x46   :  { %455 = vmatpush.bf16.msra.mxu3 %v891_v1  ;;  %611 = vmatpush.bf16.msrb.mxu1 %v1115_v9 }
  0x49   :  { %443 = vmatpush.bf16.msra.mxu2 %v879_v5  ;;  %599 = vmatpush.bf16.msrb.mxu0 %v1106_v10  ;;  %v1149_v10 = vld [vmem:[%s1530_s12] ss:$0 sm:$0xff] }
  0x4a   :  { %456 = vmatpush.bf16.msra.mxu3 %v883_v7  ;;  %612 = vmatpush.bf16.msrb.mxu1 %v1114_v11 }
  0x4d   :  { %600 = vmatpush.bf16.msrb.mxu0 %v1105_v12  ;;  %694 = vmatpush.bf16.msrb.mxu2 %v1123_v30 }
  0x4e   :  { %613 = vmatpush.bf16.msrb.mxu1 %v1113_v13  ;;  %777 = vmatpush.bf16.msrb.mxu3 %v1131_v51 }
  0x51   :  { %601 = vmatpush.bf16.msrb.mxu0 %v1104_v14  ;;  %695 = vmatpush.bf16.msrb.mxu2 %v1122_v31 }
  0x52   :  { %614 = vmatpush.bf16.msrb.mxu1 %v1112_v15  ;;  %778 = vmatpush.bf16.msrb.mxu3 %v1130_v52 }
  0x55   :  { %602 = vmatpush.bf16.msrb.mxu0 %v1103_v16  ;;  %696 = vmatpush.bf16.msrb.mxu2 %v1121_v32 }
  0x56   :  { %615 = vmatpush.bf16.msrb.mxu1 %v1111_v17  ;;  %779 = vmatpush.bf16.msrb.mxu3 %v1129_v53 }
  0x59   :  { %603 = vmatpush.bf16.msrb.mxu0 %v1102_v18  ;;  %697 = vmatpush.bf16.msrb.mxu2 %v1120_v33 }
  0x5a   :  { %616 = vmatpush.bf16.msrb.mxu1 %v1110_v19 }
  0x5d   :  { %604 = vmatpush.bf16.msrb.mxu0 %v1101_v26  ;;  %698 = vmatpush.bf16.msrb.mxu2 %v1119_v34 }
  0x5e   :  { %617 = vmatpush.bf16.msrb.mxu1 %v1109_v27 }
  0x61   :  { %605 = vmatpush.bf16.msrb.mxu0 %v1100_v28  ;;  %699 = vmatpush.bf16.msrb.mxu2 %v1118_v36 }
  0x62   :  { %618 = vmatpush.bf16.msrb.mxu1 %v1108_v29 }
  0x65   :  { %700 = vmatpush.bf16.msrb.mxu2 %v1117_v49 }
  0x69   :  { %701 = vmatpush.bf16.msrb.mxu2 %v1116_v50 }
  0xc1   :  { %v245_v55 = vpop.f32.mrf.mxu0 }
  0xc2   :  { %v246_v56 = vadd.f32 %v1145_v54, %v245_v55  ;;  %v1128_v54 = vld [vmem:[#allocation14 + $0x20] sm:$0xff]  ;;  %v1127_v55 = vld [vmem:[#allocation14 + $0x18] sm:$0xff] }
  0xc3   :  { %780 = vmatpush.bf16.msrb.mxu3 %v1128_v54 }
  0xc4   :  { %v249_v57 = vmax.f32 %v246_v56, 0.0  ;;  %v1126_v56 = vld [vmem:[#allocation14 + $0x10] sm:$0xff] }
  0xc6   :  { %v250_v58 = vpack.c.bf16 %v249_v57, %v249_v57  ;;  %v1147_v57 = vld [vmem:[%s1526_s8] ss:$0 sm:$0xff] }
  0xc7   :  { %781 = vmatpush.bf16.msrb.mxu3 %v1127_v55 }
  0xc8   :  { %327 = vmatmul.bf16.vlgmr.msra.gmra.mxu1 %v250_v58 }
  0xc9   :  { %v247_v59 = vpop.f32.mrf.mxu0 }
  0xcb   :  { %782 = vmatpush.bf16.msrb.mxu3 %v1126_v56 }
  0xcf   :  { %783 = vmatpush.bf16.msrb.mxu3 %v1125_v2 }
  0xd3   :  { %784 = vmatpush.bf16.msrb.mxu3 %v1124_v3 }
 0x145   :  { %v328_v21 = vpop.f32.mrf.mxu1 }
 0x146   :  { %v329_v22 = vadd.f32 %v1146_v20, %v328_v21 }
 0x148   :  { %v332_v23 = vmax.f32 %v329_v22, 0.0 }
 0x14a   :  { %v333_v24 = vpack.c.bf16 %v332_v23, %v332_v23 }
 0x14c   :  { %444 = vmatmul.bf16.vlgmr.msra.gmra.mxu2 %v333_v24  ;;  %457 = vmatmul.bf16.vlgmr.msra.gmra.mxu3 %v333_v24 }
 0x14d   :  { %v330_v25 = vpop.f32.mrf.mxu1 }
 0x1cf   :  { %v445_v39 = vpop.f32.mrf.mxu2  ;;  %v458_v40 = vpop.f32.mrf.mxu3 }
 0x1d0   :  { %v446_v41 = vadd.f32 %v445_v39, %v352_v37  ;;  %v459_v42 = vadd.f32 %v458_v40, %v353_v38 }
 0x1d2   :  { %v462_v43 = vmax.f32 %v446_v41, 0.0  ;;  %v463_v44 = vmax.f32 %v459_v42, 0.0 }
 0x1d4   :  { %v464_v45 = vpack.c.bf16 %v462_v43, %v462_v43  ;;  %v465_v46 = vpack.c.bf16 %v463_v44, %v463_v44 }
 0x1d6   :  { %606 = vmatmul.bf16.vlgmr.msrb.gmra.mxu0 %v464_v45  ;;  %619 = vmatmul.bf16.vlgmr.msrb.gmra.mxu1 %v465_v46 }
 0x1d7   :  { %v447_v47 = vpop.f32.mrf.mxu2  ;;  %v460_v48 = vpop.f32.mrf.mxu3 }
 0x253   :  { %v607_v58 = vpop.f32.mrf.mxu0  ;;  %v620_v59 = vpop.f32.mrf.mxu1 }
 0x254   :  { %v608_v60 = vadd.f32 %v1147_v57, %v607_v58 }
 0x256   :  { %v621_v61 = vadd.f32 %v620_v59, %v608_v60 }
 0x258   :  { %v624_v62 = vmax.f32 %v621_v61, 0.0 }
 0x25a   :  { %v625_v63 = vpack.c.bf16 %v624_v62, %v624_v62 }
 0x25b   :  { %v609_v0 = vpop.f32.mrf.mxu0  ;;  %v622_v1 = vpop.f32.mrf.mxu1 }
 0x25c   :  { %702 = vmatmul.bf16.vlgmr.msrb.gmra.mxu2 %v625_v63 }
 0x2df   :  { %v703_v5 = vpop.f32.mrf.mxu2 }
 0x2e0   :  { %v704_v6 = vadd.f32 %v1148_v4, %v703_v5 }
 0x2e2   :  { %v707_v7 = vmax.f32 %v704_v6, 0.0 }
 0x2e4   :  { %v708_v8 = vpack.c.bf16 %v707_v7, %v707_v7 }
 0x2e6   :  { %785 = vmatmul.bf16.vlgmr.msrb.gmra.mxu3 %v708_v8 }
 0x2e7   :  { %v705_v9 = vpop.f32.mrf.mxu2 }
 0x369   :  { %v786_v11 = vpop.f32.mrf.mxu3 }
 0x36a   :  { %v787_v12 = vadd.f32 %v1149_v10, %v786_v11 }
 0x36c   :  { %790 = vst [vmem:[#allocation16] sm:$0xff] %v787_v12 }
 0x36d   :  { %801 = dma.vmem_to_hbm [thread:$0]  %s797_s0, 128, %s799_s19, [#allocation4]  }
 0x371   :  { %v788_v13 = vpop.f32.mrf.mxu3 }
 0x372   :  { %1376 = dma.done.wait [#allocation4], 128  }
 0x373   :  { %1377 = vsyncadd [#allocation4], 4294967168 }
 0x374   :  { %806 = vsyncpa [#allocation3], 1 }
 0x375   :  { %807 = vsyncpa [#allocation6], 1 }
 0x376   :  { %808 = vsyncpa [#allocation9], 1 }
 0x377   :  { %809 = vsyncpa [#allocation12], 1 }
 0x378   :  { %810 = vsyncpa [#allocation15], 1 }
 0x379   :  { %811 = vsyncpa [#allocation4], 1 }

</bundles_post_ra>
